<compile_context>
chip_gen: v7x
topology: tpu7x:2x2x1
jax: 0.10.0
libtpu: 0.0.40
codegen_flags: <defaults>
</compile_context>

<pallas_src>
import functools
import math

import jax
import jax.numpy as jnp
from jax.experimental import pallas as pl
from jax.experimental.pallas import tpu as pltpu


def _linformer_kernel(x_ref, wq_ref, bq_ref, wk_ref, bk_ref, wv_ref, bv_ref,
                      e_ref, f_ref, wo_ref, bo_ref, mask_ref, o_ref,
                      *, n, n_head, exact_softmax):
    f32 = jnp.float32
    bf16 = jnp.bfloat16

    rows, d = x_ref.shape            # rows = batch_block * n
    bb = rows // n
    kdim = e_ref.shape[0]

    # ---- Q/K/V projections: one (rows, D) x (D, D) MXU matmul each ---------------
    # (1/sqrt(head_dim) is already folded into Wq / bq by the wrapper.)
    x2 = x_ref[...].astype(bf16)
    q2 = (jnp.dot(x2, wq_ref[...], preferred_element_type=f32) + bq_ref[...]).astype(bf16)
    k2 = (jnp.dot(x2, wk_ref[...], preferred_element_type=f32) + bk_ref[...]).astype(bf16)
    v2 = (jnp.dot(x2, wv_ref[...], preferred_element_type=f32) + bv_ref[...]).astype(bf16)

    # Per-batch views for the attention core; n % 8 == 0 keeps these reshapes
    # tile-preserving (no VMEM relayout).  They are correct either way.
    q3 = q2.reshape(bb, n, d)
    k3 = k2.reshape(bb, n, d)
    v3 = v2.reshape(bb, n, d)

    # ---- Linformer compression, batched over the batch-block axis ----------------
    # kc[b] = E @ K[b], vc[b] = F @ V[b]  ->  (bb, Kc, D), lane-dense D output.
    # E/F are broadcast over bb once per grid step so every matmul below is a
    # standard batched NN/NT dot_general (same patterns as flash attention).
    e_b = jnp.broadcast_to(e_ref[...], (bb, kdim, n))
    f_b = jnp.broadcast_to(f_ref[...], (bb, kdim, n))
    kc = jnp.einsum('bcn,bnd->bcd', e_b, k3, preferred_element_type=f32).astype(bf16)
    vc = jnp.einsum('bcn,bnd->bcd', f_b, v3, preferred_element_type=f32).astype(bf16)

    # ---- All heads in one batched matmul (masked-head trick) ---------------------
    # Rows index (head, position); lanes stay D-wide.  Masking Q to head h's lane
    # block makes the full-D contraction equal the per-head head_dim contraction,
    # with no lane-axis slicing or transposes.  Costs n_head x redundant MXU flops
    # (cheap while the MXU is otherwise idle at these sizes).
    # TODO(synk): gate this on v5e / head-batch it at production shapes (see header).
    mask = mask_ref[...]                                        # (H*n, D) bf16
    qm = jnp.concatenate([q3] * n_head, axis=1) * mask[None]    # (bb, H*n, D) bf16

    s = jnp.einsum('brd,bcd->brc', qm, kc, preferred_element_type=f32)   # (bb, H*n, Kc)
    s = s - jnp.max(s, axis=-1, keepdims=True)
    p = jnp.exp(s)
    denom = jnp.sum(p, axis=-1, keepdims=True)
    if exact_softmax:
        p = p / denom
    else:
        p = p * pl.reciprocal(denom, approx=True)   # EUP slot; ~1e-3 rel. error

    # TODO(synk): attention dropout omitted (eval / drop_prob == 0).
    av = jnp.einsum('brc,bcd->brd', p.astype(bf16), vc,
                    preferred_element_type=f32)                 # (bb, H*n, D)

    # Recombine heads: each output lane belongs to exactly one head, so a masked
    # sum of the H sublane blocks == concat over heads (exact; static tile-aligned
    # slices, no relayout, no concatenate).
    avm = av.astype(bf16) * mask[None]
    ctx3 = avm[:, 0:n, :]
    for h in range(1, n_head):
        ctx3 = ctx3 + avm[:, h * n:(h + 1) * n, :]
    ctx2 = ctx3.reshape(rows, d)                                # tile-preserving

    # ---- fc_concat over all rows of the batch block -------------------------------
    out = jnp.dot(ctx2, wo_ref[...], preferred_element_type=f32) + bo_ref[...]
    # TODO(synk): with d_model < 128 this store is lane-masked; production shapes
    # should use D % 128 == 0 (and optionally a bf16 out dtype) for lane-dense vst.
    o_ref[...] = out.astype(o_ref.dtype)


def _pick_batch_block(batch, n, d, n_head, kdim, *, rows_target=512,
                      vmem_budget=40 * 1024 * 1024):
    """How many batch elements to fold into one grid step.

    Targets >= `rows_target` projection rows per step (MXU friendly), keeps the
    grid >= 2 steps whenever possible (feeds both v7x TensorCores), caps an
    estimate of the per-step VMEM footprint, and must divide `batch`."""
    def est(b):
        rows = b * n
        r = 2 * 2 * rows * d * 4                 # x / out blocks, double-buffered f32
        r += 3 * rows * d * 2                    # q / k / v bf16
        r += 2 * b * kdim * d * 2                # kc / vc bf16
        r += 2 * n_head * rows * d * 2           # qm + masked av bf16
        r += 2 * b * n_head * n * kdim * 4       # scores + probs f32
        r += n_head * rows * d * 4               # av f32
        r += 2 * b * kdim * max(n, 128) * 2      # broadcast E/F (lane-padded) bf16
        return r

    bb = max(1, min(batch, max(1, rows_target // max(n, 1))))
    if batch >= 2:
        bb = min(bb, batch // 2)                 # >= 2 grid steps when possible
    bb = max(bb, 1)
    while bb > 1 and (batch % bb != 0 or est(bb) > vmem_budget):
        bb -= 1
    return bb


def linformer_self_attention(x, params, *, n_head, batch_block=None,
                             exact_softmax=False):
    """Forward pass of LinformerSelfAttention_CF (pruning=False, eval mode)."""
    batch, n, d = x.shape
    assert d % n_head == 0
    head_dim = d // n_head
    kdim = params["E"].shape[0]
    assert params["E"].shape == (kdim, n) and params["F"].shape == (kdim, n)

    if batch_block is None:
        batch_block = _pick_batch_block(batch, n, d, n_head, kdim)
    assert batch % batch_block == 0
    grid = (batch // batch_block,)
    rows_blk = batch_block * n

    inv_scale = 1.0 / math.sqrt(float(head_dim))
    f32 = jnp.float32
    bf16 = jnp.bfloat16

    # bf16 MXU operands (accumulation stays f32 in-kernel); biases stay f32.
    # NOTE: in production do this once at parameter-prep time, not per call.
    wq = (params["Wq"].astype(f32) * inv_scale).astype(bf16)   # fold 1/sqrt(hd) into Q
    bq = params["bq"].astype(f32) * inv_scale
    wk = params["Wk"].astype(bf16)
    wv = params["Wv"].astype(bf16)
    wo = params["Wo"].astype(bf16)
    e_mat = params["E"].astype(bf16)   # (Kc, N): lane-pads N->128 in VMEM (~64 KiB, negligible)
    f_mat = params["F"].astype(bf16)

    # Per-(head, position) lane mask for the masked-head trick (bf16, precomputed).
    lane = jnp.arange(d, dtype=jnp.int32)[None, :]
    head_of_row = jnp.repeat(jnp.arange(n_head, dtype=jnp.int32), n)[:, None]
    head_mask = ((lane // head_dim) == head_of_row).astype(bf16)       # (H*N, D)

    # Flatten to lane-major 2-D (rows, D): x loads and out stores need no in-kernel
    # reshape, and the projections see batch_block*N rows per MXU matmul.
    x2 = x.reshape(batch * n, d)

    kernel = functools.partial(_linformer_kernel, n=n, n_head=n_head,
                               exact_softmax=exact_softmax)

    const2 = lambda g: (0, 0)
    # TODO(synk): single-buffer the constant weight/E/F blocks
    # (pipeline_mode=pl.Buffered(1)) to reclaim VMEM at v7x production shapes.
    out2 = pl.pallas_call(
        kernel,
        out_shape=jax.ShapeDtypeStruct((batch * n, d), x.dtype),
        grid=grid,
        in_specs=[
            pl.BlockSpec((rows_blk, d), lambda g: (g, 0)),   # x (flattened rows)
            pl.BlockSpec((d, d), const2),        # Wq (pre-scaled)
            pl.BlockSpec((1, d), const2),        # bq (pre-scaled)
            pl.BlockSpec((d, d), const2),        # Wk
            pl.BlockSpec((1, d), const2),        # bk
            pl.BlockSpec((d, d), const2),        # Wv
            pl.BlockSpec((1, d), const2),        # bv
            pl.BlockSpec((kdim, n), const2),     # E
            pl.BlockSpec((kdim, n), const2),     # F
            pl.BlockSpec((d, d), const2),        # Wo (fc_concat)
            pl.BlockSpec((1, d), const2),        # bo
            pl.BlockSpec((n_head * n, d), const2),   # head lane mask (bf16)
        ],
        out_specs=pl.BlockSpec((rows_blk, d), lambda g: (g, 0)),
        compiler_params=pltpu.CompilerParams(
            dimension_semantics=("parallel",),
            vmem_limit_bytes=48 * 1024 * 1024),
    )(x2, wq, bq, wk, params["bk"], wv, params["bv"],
      e_mat, f_mat, wo, params["bo"], head_mask)

    return out2.reshape(batch, n, d)


def _reference(x, params, *, n_head):
    """Pure-JAX f32 reference mirroring the PyTorch forward (pruning=False, eval)."""
    b, n, d = x.shape
    hd = d // n_head
    scale = math.sqrt(float(hd))

    q = x @ params["Wq"] + params["bq"]
    k = x @ params["Wk"] + params["bk"]
    v = x @ params["Wv"] + params["bv"]

    def split(t):  # (B, N, D) -> (B, H, N, hd)
        return t.reshape(b, n, n_head, hd).transpose(0, 2, 1, 3)

    ql, kl, vl = split(q), split(k), split(v)
    kl = jnp.einsum("kn,bhnd->bhkd", params["E"], kl)
    vl = jnp.einsum("kn,bhnd->bhkd", params["F"], vl)

    scores = jnp.einsum("bhnd,bhkd->bhnk", ql, kl) / scale
    attn = jax.nn.softmax(scores, axis=-1)
    out = jnp.einsum("bhnk,bhkd->bhnd", attn, vl)
    out = out.transpose(0, 2, 1, 3).reshape(b, n, d)
    return out @ params["Wo"] + params["bo"]


if __name__ == "__main__":
    B, N, D = 2, 8, 32          # batch, n_position, d_model
    N_HEAD = 4                  # head_dim = 8
    KDIM = 256                  # the module hard-codes self.k = 256

    key = jax.random.PRNGKey(0)
    keys = jax.random.split(key, 12)

    def init_linear(kw, kb, d_in, d_out):
        lim = 1.0 / math.sqrt(d_in)
        w = jax.random.uniform(kw, (d_in, d_out), jnp.float32, -lim, lim)
        b = jax.random.uniform(kb, (1, d_out), jnp.float32, -lim, lim)
        return w, b

    Wq, bq = init_linear(keys[0], keys[1], D, D)
    Wk, bk = init_linear(keys[2], keys[3], D, D)
    Wv, bv = init_linear(keys[4], keys[5], D, D)
    Wo, bo = init_linear(keys[6], keys[7], D, D)
    E = jax.random.normal(keys[8], (KDIM, N), jnp.float32)
    F = jax.random.normal(keys[9], (KDIM, N), jnp.float32)
    x = jax.random.normal(keys[10], (B, N, D), jnp.float32)

    params = dict(Wq=Wq, bq=bq, Wk=Wk, bk=bk, Wv=Wv, bv=bv,
                  E=E, F=F, Wo=Wo, bo=bo)

    out = jax.block_until_ready(linformer_self_attention(x, params, n_head=N_HEAD))
    ref = _reference(x, params, n_head=N_HEAD)

    assert out.shape == (B, N, D)
    # bf16 MXU operands (f32 accumulation) + approx softmax reciprocal => relaxed
    # tolerance vs the f32 reference.
    max_err = float(jnp.max(jnp.abs(out - ref)))
    assert jnp.allclose(out, ref, atol=2e-2, rtol=2e-2), f"mismatch vs ref: {max_err}"

    print("KERNEL_OK")
</pallas_src>

<mosaic_0001>
module attributes {stable_mosaic.version = 11 : i64} {
  func.func @_linformer_kernel(%arg0: i32, %arg1: memref<8x32xf32, #tpu.memory_space<vmem>>, %arg2: memref<32x32xbf16, #tpu.memory_space<vmem>>, %arg3: memref<1x32xf32, #tpu.memory_space<vmem>>, %arg4: memref<32x32xbf16, #tpu.memory_space<vmem>>, %arg5: memref<1x32xf32, #tpu.memory_space<vmem>>, %arg6: memref<32x32xbf16, #tpu.memory_space<vmem>>, %arg7: memref<1x32xf32, #tpu.memory_space<vmem>>, %arg8: memref<256x8xbf16, #tpu.memory_space<vmem>>, %arg9: memref<256x8xbf16, #tpu.memory_space<vmem>>, %arg10: memref<32x32xbf16, #tpu.memory_space<vmem>>, %arg11: memref<1x32xf32, #tpu.memory_space<vmem>>, %arg12: memref<32x32xbf16, #tpu.memory_space<vmem>>, %arg13: memref<8x32xf32, #tpu.memory_space<vmem>>) attributes {dimension_semantics = [#tpu.dimension_semantics<parallel>], iteration_bounds = array<i64: 2>, scalar_prefetch = 0 : i64, scratch_operands = 0 : i64, tpu.core_type = #tpu.core_type<tc>, window_params = [{transform_indices = @transform_0, window_bounds = array<i64: 8, 32>}, {pipeline_mode = #tpu.pipeline_mode<synchronous>, transform_indices = @transform_1, window_bounds = array<i64: 32, 32>}, {pipeline_mode = #tpu.pipeline_mode<synchronous>, transform_indices = @transform_2, window_bounds = array<i64: 1, 32>}, {pipeline_mode = #tpu.pipeline_mode<synchronous>, transform_indices = @transform_3, window_bounds = array<i64: 32, 32>}, {pipeline_mode = #tpu.pipeline_mode<synchronous>, transform_indices = @transform_4, window_bounds = array<i64: 1, 32>}, {pipeline_mode = #tpu.pipeline_mode<synchronous>, transform_indices = @transform_5, window_bounds = array<i64: 32, 32>}, {pipeline_mode = #tpu.pipeline_mode<synchronous>, transform_indices = @transform_6, window_bounds = array<i64: 1, 32>}, {pipeline_mode = #tpu.pipeline_mode<synchronous>, transform_indices = @transform_7, window_bounds = array<i64: 256, 8>}, {pipeline_mode = #tpu.pipeline_mode<synchronous>, transform_indices = @transform_8, window_bounds = array<i64: 256, 8>}, {pipeline_mode = #tpu.pipeline_mode<synchronous>, transform_indices = @transform_9, window_bounds = array<i64: 32, 32>}, {pipeline_mode = #tpu.pipeline_mode<synchronous>, transform_indices = @transform_10, window_bounds = array<i64: 1, 32>}, {pipeline_mode = #tpu.pipeline_mode<synchronous>, transform_indices = @transform_11, window_bounds = array<i64: 32, 32>}, {transform_indices = @transform_12, window_bounds = array<i64: 8, 32>}]} {
    %c0 = arith.constant 0 : index
    %c0_0 = arith.constant 0 : index
    %0 = vector.load %arg1[%c0, %c0_0] : memref<8x32xf32, #tpu.memory_space<vmem>>, vector<8x32xf32>
    %1 = arith.truncf %0 : vector<8x32xf32> to vector<8x32xbf16>
    %c0_1 = arith.constant 0 : index
    %c0_2 = arith.constant 0 : index
    %2 = vector.load %arg2[%c0_1, %c0_2] : memref<32x32xbf16, #tpu.memory_space<vmem>>, vector<32x32xbf16>
    %cst = arith.constant dense<0.000000e+00> : vector<8x32xf32>
    %3 = tpu.matmul %1, %2, %cst {dimension_numbers = #tpu.dot_dimension_numbers<[1], [0], [0], [1], [0, 0, 1, 1], [], []>} : vector<8x32xbf16>, vector<32x32xbf16>, vector<8x32xf32> -> vector<8x32xf32>
    %c0_3 = arith.constant 0 : index
    %c0_4 = arith.constant 0 : index
    %4 = vector.load %arg3[%c0_3, %c0_4] : memref<1x32xf32, #tpu.memory_space<vmem>>, vector<1x32xf32>
    %5 = vector.broadcast %4 : vector<1x32xf32> to vector<8x32xf32>
    %6 = arith.addf %3, %5 : vector<8x32xf32>
    %7 = arith.truncf %6 : vector<8x32xf32> to vector<8x32xbf16>
    %c0_5 = arith.constant 0 : index
    %c0_6 = arith.constant 0 : index
    %8 = vector.load %arg4[%c0_5, %c0_6] : memref<32x32xbf16, #tpu.memory_space<vmem>>, vector<32x32xbf16>
    %cst_7 = arith.constant dense<0.000000e+00> : vector<8x32xf32>
    %9 = tpu.matmul %1, %8, %cst_7 {dimension_numbers = #tpu.dot_dimension_numbers<[1], [0], [0], [1], [0, 0, 1, 1], [], []>} : vector<8x32xbf16>, vector<32x32xbf16>, vector<8x32xf32> -> vector<8x32xf32>
    %c0_8 = arith.constant 0 : index
    %c0_9 = arith.constant 0 : index
    %10 = vector.load %arg5[%c0_8, %c0_9] : memref<1x32xf32, #tpu.memory_space<vmem>>, vector<1x32xf32>
    %11 = vector.broadcast %10 : vector<1x32xf32> to vector<8x32xf32>
    %12 = arith.addf %9, %11 : vector<8x32xf32>
    %13 = arith.truncf %12 : vector<8x32xf32> to vector<8x32xbf16>
    %c0_10 = arith.constant 0 : index
    %c0_11 = arith.constant 0 : index
    %14 = vector.load %arg6[%c0_10, %c0_11] : memref<32x32xbf16, #tpu.memory_space<vmem>>, vector<32x32xbf16>
    %cst_12 = arith.constant dense<0.000000e+00> : vector<8x32xf32>
    %15 = tpu.matmul %1, %14, %cst_12 {dimension_numbers = #tpu.dot_dimension_numbers<[1], [0], [0], [1], [0, 0, 1, 1], [], []>} : vector<8x32xbf16>, vector<32x32xbf16>, vector<8x32xf32> -> vector<8x32xf32>
    %c0_13 = arith.constant 0 : index
    %c0_14 = arith.constant 0 : index
    %16 = vector.load %arg7[%c0_13, %c0_14] : memref<1x32xf32, #tpu.memory_space<vmem>>, vector<1x32xf32>
    %17 = vector.broadcast %16 : vector<1x32xf32> to vector<8x32xf32>
    %18 = arith.addf %15, %17 : vector<8x32xf32>
    %19 = arith.truncf %18 : vector<8x32xf32> to vector<8x32xbf16>
    %20 = vector.shape_cast %7 : vector<8x32xbf16> to vector<1x8x32xbf16>
    %21 = vector.shape_cast %13 : vector<8x32xbf16> to vector<1x8x32xbf16>
    %22 = vector.shape_cast %19 : vector<8x32xbf16> to vector<1x8x32xbf16>
    %c0_15 = arith.constant 0 : index
    %c0_16 = arith.constant 0 : index
    %23 = vector.load %arg8[%c0_15, %c0_16] : memref<256x8xbf16, #tpu.memory_space<vmem>>, vector<256x8xbf16>
    %24 = vector.shape_cast %23 : vector<256x8xbf16> to vector<1x256x8xbf16>
    %c0_17 = arith.constant 0 : index
    %c0_18 = arith.constant 0 : index
    %25 = vector.load %arg9[%c0_17, %c0_18] : memref<256x8xbf16, #tpu.memory_space<vmem>>, vector<256x8xbf16>
    %26 = vector.shape_cast %25 : vector<256x8xbf16> to vector<1x256x8xbf16>
    "tpu.trace_start"() <{level = 10 : i32, message = "bcn,bnd->bcd"}> : () -> ()
    %cst_19 = arith.constant dense<0.000000e+00> : vector<1x256x32xf32>
    %27 = tpu.matmul %24, %21, %cst_19 {dimension_numbers = #tpu.dot_dimension_numbers<[2], [1], [1], [2], [0, 0, 0, 1, 1, 2], [0], [0]>} : vector<1x256x8xbf16>, vector<1x8x32xbf16>, vector<1x256x32xf32> -> vector<1x256x32xf32>
    "tpu.trace_stop"() : () -> ()
    %28 = arith.truncf %27 : vector<1x256x32xf32> to vector<1x256x32xbf16>
    "tpu.trace_start"() <{level = 10 : i32, message = "bcn,bnd->bcd"}> : () -> ()
    %cst_20 = arith.constant dense<0.000000e+00> : vector<1x256x32xf32>
    %29 = tpu.matmul %26, %22, %cst_20 {dimension_numbers = #tpu.dot_dimension_numbers<[2], [1], [1], [2], [0, 0, 0, 1, 1, 2], [0], [0]>} : vector<1x256x8xbf16>, vector<1x8x32xbf16>, vector<1x256x32xf32> -> vector<1x256x32xf32>
    "tpu.trace_stop"() : () -> ()
    %30 = arith.truncf %29 : vector<1x256x32xf32> to vector<1x256x32xbf16>
    %c0_21 = arith.constant 0 : index
    %c0_22 = arith.constant 0 : index
    %31 = vector.load %arg12[%c0_21, %c0_22] : memref<32x32xbf16, #tpu.memory_space<vmem>>, vector<32x32xbf16>
    %32 = tpu.concatenate %20, %20, %20, %20 in 1 : vector<1x8x32xbf16>, vector<1x8x32xbf16>, vector<1x8x32xbf16>, vector<1x8x32xbf16> -> vector<1x32x32xbf16>
    %33 = vector.shape_cast %31 : vector<32x32xbf16> to vector<1x32x32xbf16>
    %34 = arith.mulf %32, %33 : vector<1x32x32xbf16>
    "tpu.trace_start"() <{level = 10 : i32, message = "brd,bcd->brc"}> : () -> ()
    %cst_23 = arith.constant dense<0.000000e+00> : vector<1x32x256xf32>
    %35 = tpu.matmul %34, %28, %cst_23 {dimension_numbers = #tpu.dot_dimension_numbers<[2], [2], [1], [1], [0, 0, 0, 1, 1, 1], [0], [0]>} : vector<1x32x32xbf16>, vector<1x256x32xbf16>, vector<1x32x256xf32> -> vector<1x32x256xf32>
    "tpu.trace_stop"() : () -> ()
    %cst_24 = arith.constant dense<0xFF800000> : vector<1x32xf32>
    %36 = vector.multi_reduction <maximumf>, %35, %cst_24 [2] : vector<1x32x256xf32> to vector<1x32xf32>
    %37 = vector.shape_cast %36 : vector<1x32xf32> to vector<1x32x1xf32>
    %38 = vector.broadcast %37 : vector<1x32x1xf32> to vector<1x32x256xf32>
    %39 = arith.subf %35, %38 : vector<1x32x256xf32>
    %40 = math.exp %39 : vector<1x32x256xf32>
    %cst_25 = arith.constant dense<0.000000e+00> : vector<1x32xf32>
    %41 = vector.multi_reduction <add>, %40, %cst_25 [2] : vector<1x32x256xf32> to vector<1x32xf32>
    %42 = vector.shape_cast %41 : vector<1x32xf32> to vector<1x32x1xf32>
    %43 = tpu.reciprocal %42 {approx = true} : vector<1x32x1xf32> -> vector<1x32x1xf32>
    %44 = vector.broadcast %43 : vector<1x32x1xf32> to vector<1x32x256xf32>
    %45 = arith.mulf %40, %44 : vector<1x32x256xf32>
    %46 = arith.truncf %45 : vector<1x32x256xf32> to vector<1x32x256xbf16>
    "tpu.trace_start"() <{level = 10 : i32, message = "brc,bcd->brd"}> : () -> ()
    %cst_26 = arith.constant dense<0.000000e+00> : vector<1x32x32xf32>
    %47 = tpu.matmul %46, %30, %cst_26 {dimension_numbers = #tpu.dot_dimension_numbers<[2], [1], [1], [2], [0, 0, 0, 1, 1, 2], [0], [0]>} : vector<1x32x256xbf16>, vector<1x256x32xbf16>, vector<1x32x32xf32> -> vector<1x32x32xf32>
    "tpu.trace_stop"() : () -> ()
    %48 = arith.truncf %47 : vector<1x32x32xf32> to vector<1x32x32xbf16>
    %49 = vector.shape_cast %31 : vector<32x32xbf16> to vector<1x32x32xbf16>
    %50 = arith.mulf %48, %49 : vector<1x32x32xbf16>
    %51 = vector.extract_strided_slice %50 {offsets = [0, 0, 0], sizes = [1, 8, 32], strides = [1, 1, 1]} : vector<1x32x32xbf16> to vector<1x8x32xbf16>
    %52 = vector.extract_strided_slice %50 {offsets = [0, 8, 0], sizes = [1, 8, 32], strides = [1, 1, 1]} : vector<1x32x32xbf16> to vector<1x8x32xbf16>
    %53 = arith.addf %51, %52 : vector<1x8x32xbf16>
    %54 = vector.extract_strided_slice %50 {offsets = [0, 16, 0], sizes = [1, 8, 32], strides = [1, 1, 1]} : vector<1x32x32xbf16> to vector<1x8x32xbf16>
    %55 = arith.addf %53, %54 : vector<1x8x32xbf16>
    %56 = vector.extract_strided_slice %50 {offsets = [0, 24, 0], sizes = [1, 8, 32], strides = [1, 1, 1]} : vector<1x32x32xbf16> to vector<1x8x32xbf16>
    %57 = arith.addf %55, %56 : vector<1x8x32xbf16>
    %58 = vector.shape_cast %57 : vector<1x8x32xbf16> to vector<8x32xbf16>
    %c0_27 = arith.constant 0 : index
    %c0_28 = arith.constant 0 : index
    %59 = vector.load %arg10[%c0_27, %c0_28] : memref<32x32xbf16, #tpu.memory_space<vmem>>, vector<32x32xbf16>
    %cst_29 = arith.constant dense<0.000000e+00> : vector<8x32xf32>
    %60 = tpu.matmul %58, %59, %cst_29 {dimension_numbers = #tpu.dot_dimension_numbers<[1], [0], [0], [1], [0, 0, 1, 1], [], []>} : vector<8x32xbf16>, vector<32x32xbf16>, vector<8x32xf32> -> vector<8x32xf32>
    %c0_30 = arith.constant 0 : index
    %c0_31 = arith.constant 0 : index
    %61 = vector.load %arg11[%c0_30, %c0_31] : memref<1x32xf32, #tpu.memory_space<vmem>>, vector<1x32xf32>
    %62 = vector.broadcast %61 : vector<1x32xf32> to vector<8x32xf32>
    %63 = arith.addf %60, %62 : vector<8x32xf32>
    %c0_32 = arith.constant 0 : index
    %c0_33 = arith.constant 0 : index
    %64 = vector.load %arg13[%c0_32, %c0_33] : memref<8x32xf32, #tpu.memory_space<vmem>>, vector<8x32xf32>
    tpu.vector_store %arg13[%c0_32, %c0_33], %63 {strides = array<i32>} : memref<8x32xf32, #tpu.memory_space<vmem>>, vector<8x32xf32>,
    return
  }
  func.func @transform_0(%arg0: i32) -> (i32, i32) {
    %c0_i32 = arith.constant 0 : i32
    %c0_i32_0 = arith.constant 0 : i32
    return %arg0, %c0_i32 : i32, i32
  }
  func.func @transform_1(%arg0: i32) -> (i32, i32) {
    %c0_i32 = arith.constant 0 : i32
    %c0_i32_0 = arith.constant 0 : i32
    %c0_i32_1 = arith.constant 0 : i32
    return %c0_i32, %c0_i32_0 : i32, i32
  }
  func.func @transform_2(%arg0: i32) -> (i32, i32) {
    %c0_i32 = arith.constant 0 : i32
    %c0_i32_0 = arith.constant 0 : i32
    %c0_i32_1 = arith.constant 0 : i32
    return %c0_i32, %c0_i32_0 : i32, i32
  }
  func.func @transform_3(%arg0: i32) -> (i32, i32) {
    %c0_i32 = arith.constant 0 : i32
    %c0_i32_0 = arith.constant 0 : i32
    %c0_i32_1 = arith.constant 0 : i32
    return %c0_i32, %c0_i32_0 : i32, i32
  }
  func.func @transform_4(%arg0: i32) -> (i32, i32) {
    %c0_i32 = arith.constant 0 : i32
    %c0_i32_0 = arith.constant 0 : i32
    %c0_i32_1 = arith.constant 0 : i32
    return %c0_i32, %c0_i32_0 : i32, i32
  }
  func.func @transform_5(%arg0: i32) -> (i32, i32) {
    %c0_i32 = arith.constant 0 : i32
    %c0_i32_0 = arith.constant 0 : i32
    %c0_i32_1 = arith.constant 0 : i32
    return %c0_i32, %c0_i32_0 : i32, i32
  }
  func.func @transform_6(%arg0: i32) -> (i32, i32) {
    %c0_i32 = arith.constant 0 : i32
    %c0_i32_0 = arith.constant 0 : i32
    %c0_i32_1 = arith.constant 0 : i32
    return %c0_i32, %c0_i32_0 : i32, i32
  }
  func.func @transform_7(%arg0: i32) -> (i32, i32) {
    %c0_i32 = arith.constant 0 : i32
    %c0_i32_0 = arith.constant 0 : i32
    %c0_i32_1 = arith.constant 0 : i32
    return %c0_i32, %c0_i32_0 : i32, i32
  }
  func.func @transform_8(%arg0: i32) -> (i32, i32) {
    %c0_i32 = arith.constant 0 : i32
    %c0_i32_0 = arith.constant 0 : i32
    %c0_i32_1 = arith.constant 0 : i32
    return %c0_i32, %c0_i32_0 : i32, i32
  }
  func.func @transform_9(%arg0: i32) -> (i32, i32) {
    %c0_i32 = arith.constant 0 : i32
    %c0_i32_0 = arith.constant 0 : i32
    %c0_i32_1 = arith.constant 0 : i32
    return %c0_i32, %c0_i32_0 : i32, i32
  }
  func.func @transform_10(%arg0: i32) -> (i32, i32) {
    %c0_i32 = arith.constant 0 : i32
    %c0_i32_0 = arith.constant 0 : i32
    %c0_i32_1 = arith.constant 0 : i32
    return %c0_i32, %c0_i32_0 : i32, i32
  }
  func.func @transform_11(%arg0: i32) -> (i32, i32) {
    %c0_i32 = arith.constant 0 : i32
    %c0_i32_0 = arith.constant 0 : i32
    %c0_i32_1 = arith.constant 0 : i32
    return %c0_i32, %c0_i32_0 : i32, i32
  }
  func.func @transform_12(%arg0: i32) -> (i32, i32) {
    %c0_i32 = arith.constant 0 : i32
    %c0_i32_0 = arith.constant 0 : i32
    return %arg0, %c0_i32 : i32, i32
  }
}

</mosaic_0001>

<bundles_post_ra>
// kernel: tpu_custom_call.1
= control target key start
LH: loop header
LB: loop body
LE: loop exit
PB: predicated region body
PF: predicated region fallthrough
CT: control target
= control target key end

     0   :  { %s2588_s0 = inlined_call_operand.vmem [shape: f32[16,32], index: 0, kind: input, shape index: {}]   ;;  %s2589_s1 = inlined_call_operand.vmem [shape: bf16[32,32], index: 1, kind: input, shape index: {}]   ;;  %s2590_s2 = inlined_call_operand.vmem [shape: f32[1,32], index: 2, kind: input, shape index: {}]   ;;  %s2591_s3 = inlined_call_operand.vmem [shape: bf16[32,32], index: 3, kind: input, shape index: {}]   ;;  %s2592_s4 = inlined_call_operand.vmem [shape: f32[1,32], index: 4, kind: input, shape index: {}]   ;;  %s2593_s5 = inlined_call_operand.vmem [shape: bf16[32,32], index: 5, kind: input, shape index: {}]   ;;  %s2594_s6 = inlined_call_operand.vmem [shape: f32[1,32], index: 6, kind: input, shape index: {}]   ;;  %s2595_s7 = inlined_call_operand.vmem [shape: bf16[256,8], index: 7, kind: input, shape index: {}]   ;;  %s2596_s8 = inlined_call_operand.vmem [shape: bf16[256,8], index: 8, kind: input, shape index: {}]   ;;  %s2597_s9 = inlined_call_operand.vmem [shape: bf16[32,32], index: 9, kind: input, shape index: {}]   ;;  %s2598_s10 = inlined_call_operand.vmem [shape: f32[1,32], index: 10, kind: input, shape index: {}]   ;;  %s2599_s11 = inlined_call_operand.vmem [shape: bf16[32,32], index: 11, kind: input, shape index: {}]   ;;  %s2600_s12 = inlined_call_operand.hbm [shape: f32[16,32], index: 12, kind: output, shape index: {}]  }
   0x1   :  { %2601 = sst [smem:[#allocation5_spill]] %s2588_s0 }
   0x2   :  { %17 = vsyncpa [#allocation3], 0 }
   0x3   :  { %19 = vsyncpa [#allocation3 + $0x1], 0  ;;  %s2224_s21 = smov 0   ;;  %s2226_s22 = smov 0  }
   0x4   :  { %s2228_s23 = smov 0   ;;  %s2230_s24 = smov 0  }
   0x5 LB: > { %s2245_s25 = sadd.s32 4294967295, %s2154_s24   ;;  %s1687_s26 = sadd.s32 4294967294, %s2154_s24   ;;  %s2154_s24 = sphi %s2230_s24, %s2608_s24   ;;  %s2150_s23 = sphi %s2228_s23, %s2607_s23   ;;  %s2146_s22 = sphi %s2226_s22, %s2606_s22   ;;  %s2142_s21 = sphi %s2224_s21, %s2605_s21  }
   0x6   : > { %s2249_s27 = sadd.s32 1, %s2154_s24   ;;  %s289_s28 = sadd.s32 1, %s2150_s23 }
   0x7   : > { %s286_s29 = ssub.s32 %s2154_s24, %s2249_s27  ;;  %p299_p0 = scmp.ne.s32.totalorder %s2150_s23, %s2146_s22 }
   0x8   : > { %p287_p1 = scmp.eq.s32.totalorder %s286_s29, 0  ;;  %p300_p2 = scmp.eq.s32.totalorder %s2245_s25, 1 }
   0x9   : > { %p305_p3 = scmp.ne.s32.totalorder %s2146_s22, %s2142_s21  ;;  %p306_p4 = scmp.eq.s32.totalorder %s1687_s26, 1 }
   0xa   : > { %s2260_s30 = scalar_select %p287_p1, %s2150_s23, %s289_s28  }
   0xb   : > { %p2262_p5 = por %p300_p2, %p299_p0  ;;  %p2266_p6 = por %p306_p4, %p305_p3 }
   0xc   : > { %p1690_p7 = scmp.ge.s32.totalorder %s2154_s24, 1  ;;  %p364_p8 = scmp.lt.s32.totalorder %s2154_s24, 3 }
   0xe   : > { %p365_p9 = pnand %p1690_p7, %p364_p8 }
   0xf   : > { %v2026_v0 = vld [vmem:[%s2591_s3] sm:$0xff] (!%p365_p9)   ;;  %v2156_v1 = vmov (!%p365_p9), 0.0   ;;  %v2027_v2 = vld [vmem:[%s2591_s3 + $0x8] sm:$0xff] (!%p365_p9)   ;;  %vm2157_vm0 = vmmov (!%p365_p9), 0   ;;  %p405_p10 = scmp.lt.s32.totalorder (!%p365_p9), %s2245_s25, 1  ;;  %s2604_s0 = sld [smem:[#allocation5_spill]] (!%p365_p9) }
  0x10   : > { %368 = sbr.rel (%p365_p9) target bundleno = 1561 (0x619), region = 68  ;;  %1883 = vmatprep.subr.bf16.mxu1 (!%p365_p9), %v2156_v1  ;;  %1875 = vmatprep.subr.bf16.mxu0 (!%p365_p9), %v2156_v1  ;;  %vm435_vm1 = vcmask (!%p365_p9), 261120   ;;  %v2028_v5 = vld [vmem:[%s2595_s7] sm:$0xff] (!%p365_p9)   ;;  %vm752_vm2 = vcmask (!%p365_p9), 64512   ;;  %v2045_v7 = vld [vmem:[%s2589_s1 + $0x8] sm:$0xff] (!%p365_p9)   ;;  %vm801_vm3 = vcmask (!%p365_p9), 1043456  }
  0x11   : > { %1884 = vmatpush3.bf16.msra.mxu1 (!%p365_p9), %v2026_v0  ;;  %1887 = vmatprep.mubr.msk.bf16.mxu1 (!%p365_p9), %vm2157_vm0, %v2156_v1  ;;  %v2044_v6 = vld [vmem:[%s2589_s1] sm:$0xff] (!%p365_p9)   ;;  %v2029_v16 = vld [vmem:[%s2595_s7 + $0x8] sm:$0xff] (!%p365_p9)   ;;  %v2030_v17 = vld [vmem:[%s2595_s7 + $0x10] sm:$0xff] (!%p365_p9)   ;;  %s402_s26 = sand.u32 (!%p365_p9), 1, %s2146_s22   ;;  %s1778_s15 = sshll.u32 (!%p365_p9), %s2245_s25, 7 }
  0x12   : > { %1885 = vmatprep.subr.bf16.mxu1 (!%p365_p9), %v2156_v1  ;;  %1879 = vmatprep.mubr.msk.bf16.mxu0 (!%p365_p9), %vm2157_vm0, %v2156_v1  ;;  %v1697_v8 = vld [vmem:[%s2592_s4] ss:$0 sm:$0xff] (!%p365_p9)  ;;  %v2031_v18 = vld [vmem:[%s2595_s7 + $0x18] sm:$0xff] (!%p365_p9)   ;;  %v2033_v20 = vld [vmem:[%s2595_s7 + $0x28] sm:$0xff] (!%p365_p9)   ;;  %s2158_s28 = smov (!%p365_p9), [#allocation2]  }
  0x13   : > { %1876 = vmatpush3.bf16.msra.mxu0 (!%p365_p9), %v2044_v6  ;;  %v2032_v19 = vld [vmem:[%s2595_s7 + $0x20] sm:$0xff] (!%p365_p9)   ;;  %v2034_v21 = vld [vmem:[%s2595_s7 + $0x30] sm:$0xff] (!%p365_p9)   ;;  %v2035_v22 = vld [vmem:[%s2595_s7 + $0x38] sm:$0xff] (!%p365_p9)  }
  0x14   : > { %1877 = vmatprep.subr.bf16.mxu0 (!%p365_p9), %v2156_v1  ;;  %v2036_v23 = vld [vmem:[%s2595_s7 + $0x40] sm:$0xff] (!%p365_p9)   ;;  %v2037_v24 = vld [vmem:[%s2595_s7 + $0x48] sm:$0xff] (!%p365_p9)   ;;  %v2038_v25 = vld [vmem:[%s2595_s7 + $0x50] sm:$0xff] (!%p365_p9)  }
  0x15   : > { %1886 = vmatpush3.bf16.msra.mxu1 (!%p365_p9), %v2027_v2  ;;  %v2039_v26 = vld [vmem:[%s2595_s7 + $0x58] sm:$0xff] (!%p365_p9)   ;;  %v2040_v27 = vld [vmem:[%s2595_s7 + $0x60] sm:$0xff] (!%p365_p9)   ;;  %v2041_v28 = vld [vmem:[%s2595_s7 + $0x68] sm:$0xff] (!%p365_p9)  }
  0x16   : > { %v2042_v29 = vld [vmem:[%s2595_s7 + $0x70] sm:$0xff] (!%p365_p9)   ;;  %v2043_v30 = vld [vmem:[%s2595_s7 + $0x78] sm:$0xff] (!%p365_p9)   ;;  %v2046_v31 = vld [vmem:[%s2593_s5] sm:$0xff] (!%p365_p9)  }
  0x17   : > { %s406_s19 = scalar_select %p405_p10, %s2245_s25, 1  ;;  %1878 = vmatpush3.bf16.msra.mxu0 %v2045_v7  ;;  %v2047_v32 = vld [vmem:[%s2593_s5 + $0x8] sm:$0xff]   ;;  %v1693_v33 = vld [vmem:[%s2590_s2] ss:$0 sm:$0xff] }
  0x18   : > { %1891 = vmatprep.subr.bf16.mxu0 %v2156_v1  ;;  %v2385_v40 = vld [vmem:[%s2599_s11] sm:$0xff]   ;;  %s1615_s25 = scalar_lea.sflag [#allocation3], %s402_s26 }
  0x19   : > { %s1692_s20 = sshll.u32 %s406_s19, 3 }
  0x1a   : > { %s408_s29 = scalar_lea.vmem %s2604_s0, %s1692_s20  ;;  %s1691_s20 = sshll.u32 %s402_s26, 3 }
  0x1b   : > { %v410_v3 = vld [vmem:[%s408_s29] sm:$0xff]  ;;  %s404_s16 = scalar_lea.vmem [#allocation2], %s1691_s20  ;;  %s2545_s0 = scalar_lea.hbm %s2600_s12, %s1778_s15 }
  0x1c   : > { %v411_v4 = vpack.c.bf16 %v410_v3, %v410_v3  ;;  %s1628_s17 = sshll.u32 %s404_s16, 4  ;;  %s2096_s29 = sshll.u32 %s2158_s28, 4  ;;  %s2547_s17 = int_to_ptr.vmem [resolvable:$true] %s1628_s17  ;;  %s2097_s29 = int_to_ptr.vmem [resolvable:$false] %s2096_s29 }
  0x1d   : > { %s2092_s20 = scalar_lea.vmem %s2547_s17, 128  ;;  %s2098_s15 = scalar_lea.vmem %s2097_s29, 256 }
  0x1e   : > { %1888 = vmatmul.mubr.msk.bf16.vlgmr.msra.gmra.mrb[0].mxu1 %vm435_vm1, %v411_v4  ;;  %1880 = vmatmul.mubr.msk.bf16.vlgmr.msra.gmra.mrb[0].mxu0 %vm435_vm1, %v411_v4  ;;  %p2093_p11 = scmp.ne.s32.totalorder %s2547_s17, %s2092_s20  ;;  %p2099_p0 = scmp.lt.s32.totalorder %s2547_s17, %s2097_s29 }
  0x1f   : > { %1901 = vmatprep.mubr.msk.bf16.mxu1 %vm752_vm2, %v2028_v5  ;;  %1895 = vmatprep.mubr.msk.bf16.mxu0 %vm2157_vm0, %v2156_v1  ;;  %v2050_v5 = vld [vmem:[%s2596_s8] sm:$0xff]   ;;  %p2100_p1 = scmp.lt.s32.totalorder %s2098_s15, %s2092_s20 }
  0x20   : > { %1892 = vmatpush3.bf16.msra.mxu0 %v2046_v31  ;;  %p2094_p12 = pnand %p2093_p11, %p2262_p5 }
  0x21   : > { %1893 = vmatprep.subr.bf16.mxu0 %v2156_v1  ;;  %p2101_p2 = por %p2100_p1, %p2099_p0 }
  0x22   : > { %p2095_p13 = pneg %p2094_p12 }
  0x24   : > { %1894 = vmatpush3.bf16.msra.mxu0 %v2047_v32  ;;  %p2102_p3 = pnand %p2101_p2, %p2095_p13 }
  0x27   : > { %1896 = vmatmul.mubr.msk.bf16.vlgmr.msra.gmra.mrb[4].mxu0 %vm435_vm1, %v411_v4 }
  0x28   : > { %1935 = vmatprep.mubr.msk.bf16.mxu0 %vm752_vm2, %v2050_v5 }
  0xf1   : > { %v537_v9 = vpop.f32.mrb[0].mxu1  ;;  %v473_v34 = vpop.f32.mrb[0].mxu0 }
  0xf2   : > { %v538_v10 = vadd.f32 %v1697_v8, %v537_v9  ;;  %v1889_v11 = vpop.f32.mrb[1].mxu1  ;;  %v474_v35 = vadd.f32 %v1693_v33, %v473_v34  ;;  %v1881_v36 = vpop.f32.mrb[1].mxu0 }
  0xf3   : > { %v540_v12 = vpop.f32.mrb[2].mxu1  ;;  %v476_v37 = vpop.f32.mrb[2].mxu0 }
  0xf4   : > { %v543_v13 = vpack.c.bf16 %v538_v10, %v538_v10  ;;  %v1890_v14 = vpop.f32.mrb[3].mxu1  ;;  %v479_v38 = vpack.c.bf16 %v474_v35, %v474_v35  ;;  %v1882_v39 = vpop.f32.mrb[3].mxu0 }
  0xf6   : > { %v803_v15 = vsel %vm801_vm3, %v543_v13, 0  ;;  %1975 = vmatprep.subr.msk.bf16.mxu1 %vm801_vm3, %v543_v13  ;;  %v1295_v41 = vrot.slane %v479_v38, 4 }
  0xf7   : > { %1900 = vmatpush3.bf16.msra.mxu1 %v803_v15 }
  0xf8   : > { %v2388_v42 = vsel %vm801_vm3, %v479_v38, %v1295_v41  ;;  %v2420_v38 = vld [vmem:[%s2599_s11 + $0x8] sm:$0xff]   ;;  %v1701_v41 = vld [vmem:[%s2594_s6] ss:$0 sm:$0xff] }
  0xf9   : > { %v2392_v43 = vmul.bf16 %v2385_v40, %v2388_v42  ;;  %v1313_v39 = vmul.bf16 %v2420_v38, %v2388_v42 }
  0xfa   : > { %1902 = vmatmul.mubr.msk.bf16.vlgmr.msra.gmra.mrb[4].mxu1 %vm752_vm2, %v2029_v16 }
  0xfb   : > { %1905 = vmatprep.mubr.msk.bf16.mxu1 %vm752_vm2, %v2030_v17 }
 0x102   : > { %1906 = vmatmul.mubr.msk.bf16.gmra.mrb[8].mxu1 %vm752_vm2, %v2031_v18 }
 0x103   : > { %1909 = vmatprep.mubr.msk.bf16.mxu1 %vm752_vm2, %v2032_v19 }
 0x10a   : > { %1910 = vmatmul.mubr.msk.bf16.gmra.mrb[12].mxu1 %vm752_vm2, %v2033_v20 }
 0x10b   : > { %1913 = vmatprep.mubr.msk.bf16.mxu1 %vm752_vm2, %v2034_v21 }
 0x112   : > { %1914 = vmatmul.mubr.msk.bf16.gmra.mrb[16].mxu1 %vm752_vm2, %v2035_v22 }
 0x113   : > { %1917 = vmatprep.mubr.msk.bf16.mxu1 %vm752_vm2, %v2036_v23 }
 0x11a   : > { %1918 = vmatmul.mubr.msk.bf16.gmra.mrb[20].mxu1 %vm752_vm2, %v2037_v24 }
 0x11b   : > { %1921 = vmatprep.mubr.msk.bf16.mxu1 %vm752_vm2, %v2038_v25 }
 0x122   : > { %1922 = vmatmul.mubr.msk.bf16.gmra.mrb[24].mxu1 %vm752_vm2, %v2039_v26 }
 0x123   : > { %1925 = vmatprep.mubr.msk.bf16.mxu1 %vm752_vm2, %v2040_v27 }
 0x12a   : > { %1926 = vmatmul.mubr.msk.bf16.gmra.mrb[28].mxu1 %vm752_vm2, %v2041_v28 }
 0x12b   : > { %1929 = vmatprep.mubr.msk.bf16.mxu1 %vm752_vm2, %v2042_v29 }
 0x132   : > { %1930 = vmatmul.mubr.msk.bf16.gmra.mrb[32].mxu1 %vm752_vm2, %v2043_v30 }
 0x133   : > { %1840 = vmatprep.mubr.msk.bf16.mxu1 %vm435_vm1, %v2392_v43 }
 0x1cd   : > { %v1903_v44 = vpop.f32.mrb[4].mxu1 }
 0x1ce   : > { %v839_v45 = vpop.f32.mrb[5].mxu1 }
 0x1cf   : > { %v1904_v46 = vpop.f32.mrb[6].mxu1 }
 0x1d0   : > { %v967_v47 = vpack.c.bf16 %v1904_v46, %v1903_v44  ;;  %v842_v48 = vpop.f32.mrb[7].mxu1  ;;  %v601_v44 = vpop.f32.mrb[4].mxu0 }
 0x1d1   : > { %v966_v49 = vpack.c.bf16 %v842_v48, %v839_v45  ;;  %v602_v45 = vadd.f32 %v1701_v41, %v601_v44  ;;  %v1897_v46 = vpop.f32.mrb[5].mxu0 }
 0x1d2   : > { %v1324_v19 = vsel %vm435_vm1, %v967_v47, 0  ;;  %v604_v47 = vpop.f32.mrb[6].mxu0 }
 0x1d3   : > { %v1321_v12 = vsel %vm435_vm1, %v966_v49, 0  ;;  %v607_v48 = vpack.c.bf16 %v602_v45, %v602_v45  ;;  %v1898_v42 = vpop.f32.mrb[7].mxu0 }
 0x1d5   : > { %v1907_v50 = vpop.f32.mrb[8].mxu1  ;;  %v1111_v49 = vsel %vm801_vm3, %v607_v48, 0  ;;  %1976 = vmatprep.subr.msk.bf16.mxu0 %vm801_vm3, %v607_v48 }
 0x1d6   : > { %v855_v51 = vpop.f32.mrb[9].mxu1  ;;  %1934 = vmatpush3.bf16.msra.mxu0 %v1111_v49 }
 0x1d7   : > { %v1908_v52 = vpop.f32.mrb[10].mxu1 }
 0x1d8   : > { %v969_v53 = vpack.c.bf16 %v1908_v52, %v1907_v50  ;;  %v858_v54 = vpop.f32.mrb[11].mxu1  ;;  %v2052_v50 = vld [vmem:[%s2596_s8 + $0x10] sm:$0xff]   ;;  %v2054_v52 = vld [vmem:[%s2596_s8 + $0x20] sm:$0xff]  }
 0x1d9   : > { %v968_v55 = vpack.c.bf16 %v858_v54, %v855_v51  ;;  %v2053_v51 = vld [vmem:[%s2596_s8 + $0x18] sm:$0xff]   ;;  %v2056_v54 = vld [vmem:[%s2596_s8 + $0x30] sm:$0xff]  }
 0x1da   : > { %v1330_v33 = vsel %vm435_vm1, %v969_v53, 0  ;;  %v2055_v53 = vld [vmem:[%s2596_s8 + $0x28] sm:$0xff]  }
 0x1db   : > { %v1327_v26 = vsel %vm435_vm1, %v968_v55, 0  ;;  %v2057_v55 = vld [vmem:[%s2596_s8 + $0x38] sm:$0xff]  }
 0x1dd   : > { %v1911_v56 = vpop.f32.mrb[12].mxu1 }
 0x1de   : > { %v871_v57 = vpop.f32.mrb[13].mxu1 }
 0x1df   : > { %v1912_v58 = vpop.f32.mrb[14].mxu1 }
 0x1e0   : > { %v971_v59 = vpack.c.bf16 %v1912_v58, %v1911_v56  ;;  %v874_v60 = vpop.f32.mrb[15].mxu1  ;;  %v2058_v56 = vld [vmem:[%s2596_s8 + $0x40] sm:$0xff]   ;;  %v2060_v58 = vld [vmem:[%s2596_s8 + $0x50] sm:$0xff]  }
 0x1e1   : > { %v970_v61 = vpack.c.bf16 %v874_v60, %v871_v57  ;;  %v2059_v57 = vld [vmem:[%s2596_s8 + $0x48] sm:$0xff]   ;;  %v2062_v60 = vld [vmem:[%s2596_s8 + $0x60] sm:$0xff]  }
 0x1e2   : > { %v1336_v35 = vsel %vm435_vm1, %v971_v59, 0  ;;  %v2061_v59 = vld [vmem:[%s2596_s8 + $0x58] sm:$0xff]  }
 0x1e3   : > { %v1333_v34 = vsel %vm435_vm1, %v970_v61, 0  ;;  %v2063_v61 = vld [vmem:[%s2596_s8 + $0x68] sm:$0xff]  }
 0x1e5   : > { %v1915_v62 = vpop.f32.mrb[16].mxu1 }
 0x1e6   : > { %v887_v63 = vpop.f32.mrb[17].mxu1 }
 0x1e7   : > { %v1916_v0 = vpop.f32.mrb[18].mxu1 }
 0x1e8   : > { %v973_v2 = vpack.c.bf16 %v1916_v0, %v1915_v62  ;;  %v890_v3 = vpop.f32.mrb[19].mxu1  ;;  %v2064_v62 = vld [vmem:[%s2596_s8 + $0x70] sm:$0xff]  }
 0x1e9   : > { %v972_v4 = vpack.c.bf16 %v890_v3, %v887_v63  ;;  %v2065_v63 = vld [vmem:[%s2596_s8 + $0x78] sm:$0xff]  }
 0x1ea   : > { %v1342_v37 = vsel %vm435_vm1, %v973_v2, 0 }
 0x1eb   : > { %v1339_v36 = vsel %vm435_vm1, %v972_v4, 0 }
 0x1ed   : > { %v1919_v6 = vpop.f32.mrb[20].mxu1 }
 0x1ee   : > { %v903_v7 = vpop.f32.mrb[21].mxu1 }
 0x1ef   : > { %v1920_v8 = vpop.f32.mrb[22].mxu1 }
 0x1f0   : > { %v975_v9 = vpack.c.bf16 %v1920_v8, %v1919_v6  ;;  %v906_v10 = vpop.f32.mrb[23].mxu1 }
 0x1f1   : > { %v974_v11 = vpack.c.bf16 %v906_v10, %v903_v7 }
 0x1f3   : > { %1977 = vmatprep.subr.msk.bf16.mxu1 %vm435_vm1, %v974_v11 }
 0x1f4   : > { %1825 = vmatpush3.bf16.xpose.msra.mxu1 %v1321_v12 }
 0x1f5   : > { %1978 = vmatprep.subr.msk.bf16.mxu1 %vm435_vm1, %v975_v9  ;;  %v1923_v13 = vpop.f32.mrb[24].mxu1 }
 0x1f6   : > { %v919_v14 = vpop.f32.mrb[25].mxu1 }
 0x1f7   : > { %v1924_v15 = vpop.f32.mrb[26].mxu1 }
 0x1f8   : > { %v977_v16 = vpack.c.bf16 %v1924_v15, %v1923_v13  ;;  %v922_v17 = vpop.f32.mrb[27].mxu1 }
 0x1f9   : > { %v976_v18 = vpack.c.bf16 %v922_v17, %v919_v14 }
 0x1fc   : > { %1827 = vmatpush3.bf16.xpose.msra.mxu1 %v1324_v19 }
 0x1fd   : > { %1979 = vmatprep.subr.msk.bf16.mxu1 %vm435_vm1, %v976_v18  ;;  %v1927_v20 = vpop.f32.mrb[28].mxu1 }
 0x1fe   : > { %v935_v21 = vpop.f32.mrb[29].mxu1 }
 0x1ff   : > { %v1928_v22 = vpop.f32.mrb[30].mxu1 }
 0x200   : > { %v979_v23 = vpack.c.bf16 %v1928_v22, %v1927_v20  ;;  %v938_v24 = vpop.f32.mrb[31].mxu1 }
 0x201   : > { %v978_v25 = vpack.c.bf16 %v938_v24, %v935_v21 }
 0x204   : > { %1829 = vmatpush3.bf16.xpose.msra.mxu1 %v1327_v26 }
 0x205   : > { %1980 = vmatprep.subr.msk.bf16.mxu1 %vm435_vm1, %v977_v16  ;;  %v1931_v27 = vpop.f32.mrb[32].mxu1 }
 0x206   : > { %v951_v28 = vpop.f32.mrb[33].mxu1 }
 0x207   : > { %v1932_v29 = vpop.f32.mrb[34].mxu1 }
 0x208   : > { %v981_v30 = vpack.c.bf16 %v1932_v29, %v1931_v27  ;;  %v954_v31 = vpop.f32.mrb[35].mxu1 }
 0x209   : > { %v980_v32 = vpack.c.bf16 %v954_v31, %v951_v28 }
 0x20c   : > { %1831 = vmatpush3.bf16.xpose.msra.mxu1 %v1330_v33 }
 0x20d   : > { %1981 = vmatprep.subr.msk.bf16.mxu1 %vm435_vm1, %v978_v25 }
 0x214   : > { %1833 = vmatpush3.bf16.xpose.msra.mxu1 %v1333_v34 }
 0x215   : > { %1982 = vmatprep.subr.msk.bf16.mxu1 %vm435_vm1, %v979_v23 }
 0x21c   : > { %1835 = vmatpush3.bf16.xpose.msra.mxu1 %v1336_v35 }
 0x21d   : > { %1983 = vmatprep.subr.msk.bf16.mxu1 %vm435_vm1, %v980_v32 }
 0x224   : > { %1837 = vmatpush3.bf16.xpose.msra.mxu1 %v1339_v36 }
 0x225   : > { %1984 = vmatprep.subr.msk.bf16.mxu1 %vm435_vm1, %v981_v30 }
 0x22c   : > { %1839 = vmatpush3.bf16.xpose.msra.mxu1 %v1342_v37 }
 0x22d   : > { %1967 = vmatprep.subr.bf16.mxu1 %v2156_v1 }
 0x233   : > { %1841 = vmatmul.mubr.msk.bf16.vlgmr.msra.gmra.mrb[36].mxu1 %vm435_vm1, %v2392_v43  ;;  %v2051_v43 = vld [vmem:[%s2596_s8 + $0x8] sm:$0xff]  }
 0x234   : > { %1842 = vmatprep.mubr.msk.bf16.mxu1 %vm435_vm1, %v1313_v39  ;;  %1936 = vmatmul.mubr.msk.bf16.vlgmr.msra.gmra.mrb[8].mxu0 %vm752_vm2, %v2051_v43 }
 0x235   : > { %1939 = vmatprep.mubr.msk.bf16.mxu0 %vm752_vm2, %v2052_v50 }
 0x23b   : > { %1843 = vmatmul.mubr.msk.bf16.gmra.mrb[40].mxu1 %vm435_vm1, %v1313_v39 }
 0x23c   : > { %1971 = vmatprep.mubr.msk.bf16.mxu1 %vm2157_vm0, %v2156_v1  ;;  %1940 = vmatmul.mubr.msk.bf16.gmra.mrb[12].mxu0 %vm752_vm2, %v2053_v51 }
 0x23d   : > { %1943 = vmatprep.mubr.msk.bf16.mxu0 %vm752_vm2, %v2054_v52 }
 0x244   : > { %1944 = vmatmul.mubr.msk.bf16.gmra.mrb[16].mxu0 %vm752_vm2, %v2055_v53 }
 0x245   : > { %1947 = vmatprep.mubr.msk.bf16.mxu0 %vm752_vm2, %v2056_v54 }
 0x24c   : > { %1948 = vmatmul.mubr.msk.bf16.gmra.mrb[20].mxu0 %vm752_vm2, %v2057_v55 }
 0x24d   : > { %1951 = vmatprep.mubr.msk.bf16.mxu0 %vm752_vm2, %v2058_v56 }
 0x254   : > { %1952 = vmatmul.mubr.msk.bf16.gmra.mrb[24].mxu0 %vm752_vm2, %v2059_v57 }
 0x255   : > { %1955 = vmatprep.mubr.msk.bf16.mxu0 %vm752_vm2, %v2060_v58 }
 0x25c   : > { %1956 = vmatmul.mubr.msk.bf16.gmra.mrb[28].mxu0 %vm752_vm2, %v2061_v59 }
 0x25d   : > { %1959 = vmatprep.mubr.msk.bf16.mxu0 %vm752_vm2, %v2062_v60 }
 0x264   : > { %1960 = vmatmul.mubr.msk.bf16.gmra.mrb[32].mxu0 %vm752_vm2, %v2063_v61 }
 0x265   : > { %1963 = vmatprep.mubr.msk.bf16.mxu0 %vm752_vm2, %v2064_v62 }
 0x26c   : > { %1964 = vmatmul.mubr.msk.bf16.gmra.mrb[36].mxu0 %vm752_vm2, %v2065_v63 }
 0x306   : > { %v2495_v0 = vpop.f32.mrb[36].mxu1 }
 0x307   : > { %v2497_v2 = vpop.f32.mrb[37].mxu1  ;;  %v1937_v13 = vpop.f32.mrb[8].mxu0 }
 0x308   : > { %v2499_v3 = vpop.f32.mrb[38].mxu1  ;;  %v1421_v4 = vmax.f32 %v2495_v0, %v2497_v2  ;;  %v1147_v14 = vpop.f32.mrb[9].mxu0 }
 0x309   : > { %v2503_v5 = vpop.f32.mrb[39].mxu1  ;;  %v1938_v15 = vpop.f32.mrb[10].mxu0 }
 0x30a   : > { %1422 = vmax.xlane.f32.xlu0 %v1421_v4  ;;  %v1424_v6 = vmax.f32 %v2499_v3, %v2503_v5  ;;  %v1275_v16 = vpack.c.bf16 %v1938_v15, %v1937_v13  ;;  %v1150_v17 = vpop.f32.mrb[11].mxu0 }
 0x30b   : > { %v1274_v18 = vpack.c.bf16 %v1150_v17, %v1147_v14 }
 0x30e   : > { %1425 = vmax.xlane.f32.xlu0 %v1424_v6  ;;  %v2507_v7 = vpop.f32.mrb[40].mxu1 }
 0x30f   : > { %v2509_v8 = vpop.f32.mrb[41].mxu1  ;;  %v1941_v19 = vpop.f32.mrb[12].mxu0 }
 0x310   : > { %v2511_v9 = vpop.f32.mrb[42].mxu1  ;;  %v1427_v10 = vmax.f32 %v2507_v7, %v2509_v8  ;;  %v1163_v20 = vpop.f32.mrb[13].mxu0 }
 0x311   : > { %v2515_v11 = vpop.f32.mrb[43].mxu1  ;;  %v1942_v21 = vpop.f32.mrb[14].mxu0 }
 0x312   : > { %1428 = vmax.xlane.f32.xlu1 %v1427_v10  ;;  %v1430_v12 = vmax.f32 %v2511_v9, %v2515_v11  ;;  %v1277_v22 = vpack.c.bf16 %v1942_v21, %v1941_v19  ;;  %v1166_v23 = vpop.f32.mrb[15].mxu0 }
 0x313   : > { %v1276_v24 = vpack.c.bf16 %v1166_v23, %v1163_v20 }
 0x316   : > { %1431 = vmax.xlane.f32.xlu1 %v1430_v12 }
 0x317   : > { %v1945_v25 = vpop.f32.mrb[16].mxu0 }
 0x318   : > { %v1179_v26 = vpop.f32.mrb[17].mxu0 }
 0x319   : > { %v1946_v27 = vpop.f32.mrb[18].mxu0 }
 0x31a   : > { %v1279_v28 = vpack.c.bf16 %v1946_v27, %v1945_v25  ;;  %v1182_v29 = vpop.f32.mrb[19].mxu0 }
 0x31b   : > { %v1278_v30 = vpack.c.bf16 %v1182_v29, %v1179_v26 }
 0x31f   : > { %v1949_v31 = vpop.f32.mrb[20].mxu0 }
 0x320   : > { %v1195_v32 = vpop.f32.mrb[21].mxu0 }
 0x321   : > { %v1950_v33 = vpop.f32.mrb[22].mxu0 }
 0x322   : > { %v1281_v34 = vpack.c.bf16 %v1950_v33, %v1949_v31  ;;  %v1198_v35 = vpop.f32.mrb[23].mxu0 }
 0x323   : > { %v1280_v36 = vpack.c.bf16 %v1198_v35, %v1195_v32 }
 0x327   : > { %v1953_v37 = vpop.f32.mrb[24].mxu0 }
 0x328   : > { %v1211_v39 = vpop.f32.mrb[25].mxu0 }
 0x329   : > { %v1954_v41 = vpop.f32.mrb[26].mxu0 }
 0x32a   : > { %v1283_v44 = vpack.c.bf16 %v1954_v41, %v1953_v37  ;;  %v1214_v45 = vpop.f32.mrb[27].mxu0 }
 0x32b   : > { %v1282_v46 = vpack.c.bf16 %v1214_v45, %v1211_v39 }
 0x32d   : > { %1844 = vmatprep.subr.bf16.mxu0 %v1282_v46 }
 0x32e   : > { %1845 = vmatpush3.bf16.msra.mxu0 %v1274_v18 }
 0x32f   : > { %v1957_v47 = vpop.f32.mrb[28].mxu0  ;;  %1846 = vmatprep.subr.bf16.mxu0 %v1283_v44 }
 0x330   : > { %v1227_v48 = vpop.f32.mrb[29].mxu0 }
 0x331   : > { %v1958_v42 = vpop.f32.mrb[30].mxu0 }
 0x332   : > { %v1285_v49 = vpack.c.bf16 %v1958_v42, %v1957_v47  ;;  %v1230_v43 = vpop.f32.mrb[31].mxu0  ;;  %1847 = vmatpush3.bf16.msra.mxu0 %v1275_v16 }
 0x333   : > { %v1284_v50 = vpack.c.bf16 %v1230_v43, %v1227_v48 }
 0x335   : > { %1848 = vmatprep.subr.bf16.mxu0 %v1284_v50 }
 0x336   : > { %1849 = vmatpush3.bf16.msra.mxu0 %v1276_v24 }
 0x337   : > { %v1961_v51 = vpop.f32.mrb[32].mxu0  ;;  %1850 = vmatprep.subr.bf16.mxu0 %v1285_v49 }
 0x338   : > { %v1243_v52 = vpop.f32.mrb[33].mxu0 }
 0x339   : > { %v1962_v53 = vpop.f32.mrb[34].mxu0 }
 0x33a   : > { %v1287_v54 = vpack.c.bf16 %v1962_v53, %v1961_v51  ;;  %v1246_v55 = vpop.f32.mrb[35].mxu0  ;;  %1851 = vmatpush3.bf16.msra.mxu0 %v1277_v22 }
 0x33b   : > { %v1286_v56 = vpack.c.bf16 %v1246_v55, %v1243_v52  ;;  %v2067_v55 = vld [vmem:[%s2597_s9 + $0x8] sm:$0xff]  }
 0x33d   : > { %1852 = vmatprep.subr.bf16.mxu0 %v1286_v56 }
 0x33e   : > { %1853 = vmatpush3.bf16.msra.mxu0 %v1278_v30 }
 0x33f   : > { %v1965_v57 = vpop.f32.mrb[36].mxu0  ;;  %1854 = vmatprep.subr.bf16.mxu0 %v1287_v54  ;;  %v2066_v54 = vld [vmem:[%s2597_s9] sm:$0xff]  }
 0x340   : > { %v1259_v58 = vpop.f32.mrb[37].mxu0  ;;  %1968 = vmatpush3.bf16.msra.mxu1 %v2066_v54 }
 0x341   : > { %v1966_v59 = vpop.f32.mrb[38].mxu0  ;;  %1969 = vmatprep.subr.bf16.mxu1 %v2156_v1 }
 0x342   : > { %v1289_v60 = vpack.c.bf16 %v1966_v59, %v1965_v57  ;;  %v1262_v61 = vpop.f32.mrb[39].mxu0  ;;  %1855 = vmatpush3.bf16.msra.mxu0 %v1279_v28 }
 0x343   : > { %v1288_v62 = vpack.c.bf16 %v1262_v61, %v1259_v58 }
 0x344   : > { %1970 = vmatpush3.bf16.msra.mxu1 %v2067_v55 }
 0x345   : > { %1856 = vmatprep.subr.bf16.mxu0 %v1288_v62 }
 0x346   : > { %1857 = vmatpush3.bf16.msra.mxu0 %v1280_v36 }
 0x347   : > { %1858 = vmatprep.subr.bf16.mxu0 %v1289_v60 }
 0x34a   : > { %1859 = vmatpush3.bf16.msra.mxu0 %v1281_v34 }
 0x397   : > { %v1423_v63 = vpop.xlane.xlu0 %1422 }
 0x398   : > { %v1433_v4 = vsub.f32 %v2495_v0, %v1423_v63  ;;  %v1434_v6 = vsub.f32 %v2497_v2, %v1423_v63 }
 0x39a   : > { %v1441_v10 = vmul.f32 1.442695, %v1433_v4  ;;  %v1443_v12 = vmul.f32 1.442695, %v1434_v6 }
 0x39b   : > { %v1426_v13 = vpop.xlane.xlu0 %1425 }
 0x39c   : > { %2068 = vpow2.f32 %v1441_v10  ;;  %v1435_v14 = vsub.f32 %v2499_v3, %v1426_v13  ;;  %v1436_v15 = vsub.f32 %v2503_v5, %v1426_v13 }
 0x39d   : > { %2070 = vpow2.f32 %v1443_v12 }
 0x39e   : > { %v1445_v16 = vmul.f32 1.442695, %v1435_v14  ;;  %v1447_v17 = vmul.f32 1.442695, %v1436_v15 }
 0x39f   : > { %v1429_v18 = vpop.xlane.xlu1 %1428 }
 0x3a0   : > { %2072 = vpow2.f32 %v1445_v16  ;;  %v1437_v19 = vsub.f32 %v2507_v7, %v1429_v18  ;;  %v1438_v20 = vsub.f32 %v2509_v8, %v1429_v18 }
 0x3a1   : > { %2074 = vpow2.f32 %v1447_v17 }
 0x3a2   : > { %v1449_v0 = vmul.f32 1.442695, %v1437_v19  ;;  %v1451_v2 = vmul.f32 1.442695, %v1438_v20 }
 0x3a3   : > { %v1432_v21 = vpop.xlane.xlu1 %1431 }
 0x3a4   : > { %2076 = vpow2.f32 %v1449_v0  ;;  %v1439_v22 = vsub.f32 %v2511_v9, %v1432_v21  ;;  %v1440_v3 = vsub.f32 %v2515_v11, %v1432_v21 }
 0x3a5   : > { %2078 = vpow2.f32 %v1451_v2 }
 0x3a6   : > { %v2069_v5 = vpop.eup %2068  ;;  %v1453_v23 = vmul.f32 1.442695, %v1439_v22  ;;  %v1455_v24 = vmul.f32 1.442695, %v1440_v3 }
 0x3a7   : > { %v2071_v25 = vpop.eup %2070 }
 0x3a8   : > { %2080 = vpow2.f32 %v1453_v23  ;;  %v1457_v26 = vadd.f32 %v2071_v25, %v2069_v5 }
 0x3a9   : > { %2082 = vpow2.f32 %v1455_v24 }
 0x3aa   : > { %v2073_v7 = vpop.eup %2072  ;;  %1458 = vadd.xlane.f32.xlu0 %v1457_v26 }
 0x3ab   : > { %v2075_v8 = vpop.eup %2074 }
 0x3ac   : > { %v1460_v27 = vadd.f32 %v2075_v8, %v2073_v7 }
 0x3ae   : > { %v2077_v28 = vpop.eup %2076  ;;  %1461 = vadd.xlane.f32.xlu1 %v1460_v27 }
 0x3af   : > { %v2079_v29 = vpop.eup %2078 }
 0x3b0   : > { %v1463_v30 = vadd.f32 %v2079_v29, %v2077_v28 }
 0x3b2   : > { %v2081_v31 = vpop.eup %2080  ;;  %1464 = vadd.xlane.f32.xlu0 %v1463_v30 }
 0x3b3   : > { %v2083_v9 = vpop.eup %2082 }
 0x3b4   : > { %v1466_v11 = vadd.f32 %v2083_v9, %v2081_v31 }
 0x3b6   : > { %1467 = vadd.xlane.f32.xlu1 %v1466_v11 }
 0x437   : > { %v1459_v32 = vpop.xlane.xlu0 %1458 }
 0x438   : > { %2084 = vrcp.f32 %v1459_v32 }
 0x43b   : > { %v1462_v33 = vpop.xlane.xlu1 %1461 }
 0x43c   : > { %2086 = vrcp.f32 %v1462_v33 }
 0x43f   : > { %v1465_v34 = vpop.xlane.xlu0 %1464 }
 0x440   : > { %2088 = vrcp.f32 %v1465_v34 }
 0x442   : > { %v2085_v36 = vpop.eup %2084 }
 0x443   : > { %v1468_v35 = vpop.xlane.xlu1 %1467  ;;  %v1473_v39 = vmul.f32 %v2085_v36, %v2069_v5  ;;  %v1474_v44 = vmul.f32 %v2085_v36, %v2071_v25 }
 0x444   : > { %2090 = vrcp.f32 %v1468_v35 }
 0x446   : > { %v2087_v37 = vpop.eup %2086 }
 0x447   : > { %v1475_v41 = vmul.f32 %v2087_v37, %v2073_v7  ;;  %v1476_v45 = vmul.f32 %v2087_v37, %v2075_v8 }
 0x449   : > { %v1482_v46 = vpack.c.bf16 %v1476_v45, %v1474_v44  ;;  %v1481_v47 = vpack.c.bf16 %v1475_v41, %v1473_v39 }
 0x44a   : > { %v2089_v48 = vpop.eup %2088 }
 0x44b   : > { %1517 = vmatprep.mubr.bf16.mxu0 %v1482_v46  ;;  %v1478_v49 = vmul.f32 %v2089_v48, %v2079_v29  ;;  %v1477_v50 = vmul.f32 %v2089_v48, %v2077_v28 }
 0x44c   : > { %1518 = vmatmul.mubr.bf16.vlgmr.msra.gmra.mrb[40].mxu0 %v1481_v47 }
 0x44e   : > { %v2091_v42 = vpop.eup %2090 }
 0x44f   : > { %v1480_v43 = vmul.f32 %v2091_v42, %v2083_v9  ;;  %v1479_v51 = vmul.f32 %v2091_v42, %v2081_v31 }
 0x451   : > { %v1484_v52 = vpack.c.bf16 %v1480_v43, %v1478_v49  ;;  %v1483_v53 = vpack.c.bf16 %v1479_v51, %v1477_v50 }
 0x453   : > { %1525 = vmatprep.mubr.bf16.mxu0 %v1484_v52 }
 0x454   : > { %1526 = vmatmul.mubr.bf16.gmra.mrb[44].mxu0 %v1483_v53 }
 0x51f   : > { %v1860_v56 = vpop.f32.mrb[40].mxu0 }
 0x520   : > { %v1861_v57 = vpop.f32.mrb[41].mxu0 }
 0x521   : > { %v1862_v58 = vadd.f32 %v1861_v57, %v1860_v56  ;;  %v1863_v59 = vpop.f32.mrb[42].mxu0 }
 0x522   : > { %v1864_v60 = vpop.f32.mrb[43].mxu0 }
 0x523   : > { %v1865_v61 = vadd.f32 %v1864_v60, %v1863_v59 }
 0x525   : > { %v1534_v62 = vpack.c.bf16 %v1865_v61, %v1862_v58 }
 0x527   : > { %v1536_v63 = vmul.bf16 %v2385_v40, %v1534_v62  ;;  %v1866_v4 = vpop.f32.mrb[44].mxu0  ;;  %v1773_v40 = vld [vmem:[%s2598_s10] ss:$0 sm:$0xff] }
 0x528   : > { %v1867_v6 = vpop.f32.mrb[45].mxu0 }
 0x529   : > { %v1868_v10 = vadd.f32 %v1867_v6, %v1866_v4  ;;  %v1869_v1 = vpop.f32.mrb[46].mxu0  ;;  %v1539_v13 = vrot.slane %v1536_v63, 4 }
 0x52a   : > { %v1870_v12 = vpop.f32.mrb[47].mxu0 }
 0x52b   : > { %v1871_v14 = vadd.f32 %v1870_v12, %v1869_v1  ;;  %v1541_v16 = vadd.bf16 %v1539_v13, %v1536_v63 }
 0x52d   : > { %v1535_v15 = vpack.c.bf16 %v1871_v14, %v1868_v10 }
 0x52f   : > { %v1537_v17 = vmul.bf16 %v2420_v38, %v1535_v15 }
 0x531   : > { %v1542_v18 = vadd.bf16 %v1541_v16, %v1537_v17  ;;  %v1544_v19 = vrot.slane %v1537_v17, 4 }
 0x533   : > { %v1546_v20 = vadd.bf16 %v1544_v19, %v1542_v18 }
 0x535   : > { %1972 = vmatmul.mubr.msk.bf16.vlgmr.msra.gmra.mrb[44].mxu1 %vm435_vm1, %v1546_v20 }
 0x608   : > { %v1607_v0 = vpop.f32.mrb[44].mxu1 }
 0x609   : > { %v1608_v2 = vadd.f32 %v1773_v40, %v1607_v0  ;;  %v1973_v21 = vpop.f32.mrb[45].mxu1 }
 0x60a   : > { %v1610_v38 = vpop.f32.mrb[46].mxu1 }
 0x60b   : > { %v1974_v22 = vpop.f32.mrb[47].mxu1  ;;  %1613 = vst.msk [vmem:[%s404_s16] sm:$0xff] %vm435_vm1, %v1608_v2 }
 0x60c   : > { %2105 = shalt.err (!%p2102_p3)
}
 0x60d   : > { %s2106_s26 = scalar_lea.hbm %s2545_s0, 128  ;;  %s2110_s19 = scalar_lea.hbm %s2600_s12, 256 }
 0x60e   : > { %p2107_p4 = scmp.ne.s32.totalorder %s2545_s0, %s2106_s26  ;;  %p2111_p9 = scmp.lt.u32.totalorder %s2545_s0, %s2600_s12 }
 0x60f   : > { %p2112_p10 = scmp.lt.u32.totalorder %s2110_s19, %s2106_s26  ;;  %p2114_p12 = scmp.lt.u32.totalorder %s2106_s26, %s2545_s0 }
 0x610   : > { %p2108_p7 = pnand %p2107_p4, %p2262_p5 }
 0x611   : > { %p2113_p11 = por %p2112_p10, %p2111_p9 }
 0x612   : > { %p2109_p8 = pneg %p2108_p7 }
 0x613   : > { %p2115_p13 = por %p2114_p12, %p2113_p11 }
 0x615   : > { %p2116_p0 = pnand %p2115_p13, %p2109_p8 }
 0x617   : > { %2119 = shalt.err (!%p2116_p0)
}
 0x618   : > { %1985 = dma.vmem_to_hbm [thread:$0]  (%p2262_p5), %s2547_s17, 128, %s2545_s0, %s1615_s25  }
 0x619 PF: > { %p1991_p1 = scmp.ge.s32.totalorder %s2154_s24, 2  ;;  %s1640_s20 = sand.u32 1, %s2142_s21  }
 0x61a   : > { %s1641_s15 = scalar_lea.sflag [#allocation3], %s1640_s20 }
 0x61b   : > { %p1988_p2 = pnand %p1991_p1, %p2266_p6 }
 0x61d   : > { %2137 = dma.done.wait (!%p1988_p2), %s1641_s15, 128  }
 0x61e   : > { %2139 = vsyncadd (!%p1988_p2), %s1641_s15, 4294967168  ;;  %p22_p3 = scmp.ge.s32.totalorder %s2249_s27, 4   ;;  %s2605_s21 = smov %s2146_s22 }
 0x61f   : > { %s2606_s22 = smov %s2150_s23  ;;  %s2607_s23 = smov %s2260_s30 }
 0x620   : > { %s2608_s24 = smov %s2249_s27  ;;  %24 = sbr.rel (!%p22_p3) target bundleno = 5 (0x5), region = 103 }
 0x627   :  { %1646 = vsyncpa [#allocation3], 1 }
 0x628   :  { %1648 = vsyncpa [#allocation3 + $0x1], 1 }

</bundles_post_ra>
